<compile_context>
chip_gen: v7x
topology: tpu7x:2x2x1
jax: 0.10.0
libtpu: 0.0.40
codegen_flags: <defaults>
</compile_context>

<pallas_src>
import functools

import jax
import jax.numpy as jnp
from jax.experimental import pallas as pl
from jax.experimental.pallas import tpu as pltpu

_LANE = 128     # lane width: padded feature dims are multiples of this
_SUBLANE = 8    # sublane alignment for the second-to-last dim


def _round_up(x, m):
    return (x + m - 1) // m * m


def _vmem_capacity_bytes():
    try:
        return int(pltpu.get_tpu_info().vmem_capacity_bytes)
    except Exception:
        return 64 << 20  # conservative (v7x per-TC)


def _default_block_m():
    try:
        kind = jax.devices()[0].device_kind.lower()
    except Exception:
        kind = ""
    # v5e MXU is 4x128^2 -> M=128 already fills it; v6e/v7x MXUs are 2x256^2.
    if "v5 lite" in kind or "v5e" in kind or "v5lite" in kind:
        return 128
    return 256


def _resident_spec(shape):
    """Whole-array block, constant index_map, single-buffered (never changes)."""
    try:
        return pl.BlockSpec(shape, lambda i: (0, 0), pipeline_mode=pl.Buffered(1))
    except TypeError:
        # Older API without pipeline_mode: fall back to default buffering.
        return pl.BlockSpec(shape, lambda i: (0, 0))


def _fused_mlp_kernel(*refs):
    """refs = (x_ref, w0, b0, w1, b1, ..., wL-1, bL-1, o_ref).

    Computes ReLU(...ReLU(x @ W0 + b0)...) @ W_{L-1} + b_{L-1} entirely in
    VMEM; only the final activation is written out.  Dots take bf16 operands
    with f32 accumulation; bias-add / ReLU are f32.
    """
    x_ref = refs[0]
    o_ref = refs[-1]
    wb_refs = refs[1:-1]
    num_linear = len(wb_refs) // 2

    h = x_ref[...].astype(jnp.float32)
    for i in range(num_linear):
        w = wb_refs[2 * i][...]                      # bf16 (K_pad, N_pad)
        b = wb_refs[2 * i + 1][...]                  # f32  (1, N_pad)
        h = jnp.dot(h.astype(jnp.bfloat16), w,
                    preferred_element_type=jnp.float32) + b
        if i != num_linear - 1:
            h = jnp.maximum(h, 0.0)                  # fused ReLU; padded lanes stay 0
    o_ref[...] = h.astype(o_ref.dtype)


def init_mlp_params(key, input_dim, hidden_dim, output_dim, num_layers):
    """Mirrors nn.Linear default init U(-1/sqrt(fan_in), +1/sqrt(fan_in)).

    Returns a list of (W, b) with W already transposed to (in, out).  Layer
    structure matches the PyTorch module: num_layers + 1 Linear layers with
    ReLU in between.
    """
    dims = [input_dim] + [hidden_dim] * num_layers + [output_dim]
    params = []
    for i in range(len(dims) - 1):
        fan_in, fan_out = dims[i], dims[i + 1]
        key, kw, kb = jax.random.split(key, 3)
        bound = 1.0 / jnp.sqrt(jnp.float32(fan_in))
        w = jax.random.uniform(kw, (fan_in, fan_out), jnp.float32, -bound, bound)
        b = jax.random.uniform(kb, (fan_out,), jnp.float32, -bound, bound)
        params.append((w, b))
    return params


def pad_mlp_params(params):
    """One-time pad/cast of weights to bf16 with lane-dense output dims.

    Layer 0's K dim is left unpadded so x needs no feature padding; every
    layer's N dim (and therefore the next layer's K dim) is padded to 128.
    Biases stay f32 and are stored as (1, out_pad).
    """
    padded = []
    for i, (w, b) in enumerate(params):
        fi, fo = w.shape
        fi_p = fi if i == 0 else _round_up(fi, _LANE)
        fo_p = _round_up(fo, _LANE)
        w_p = (jnp.zeros((fi_p, fo_p), jnp.bfloat16)
               .at[:fi, :fo].set(w.astype(jnp.bfloat16)))
        b_p = jnp.zeros((1, fo_p), jnp.float32).at[0, :fo].set(b)
        padded.append((w_p, b_p))
    return padded


def mlp_forward(padded_params, x, *, out_dim, block_m=None):
    """Fused MLP forward. x: (batch, input_dim) f32 -> (batch, out_dim) f32."""
    batch, in_dim = x.shape
    out_pad = padded_params[-1][0].shape[1]
    max_feat_pad = max(w.shape[1] for w, _ in padded_params)

    if block_m is None:
        block_m = _default_block_m()

    # Cap tm so the live (tm, feat_pad) f32 intermediate stays comfortably
    # inside the register file / VMEM (avoid turning MXU-bound into spill-bound).
    h_budget = 256 * 1024
    tm_cap = max(_SUBLANE,
                 (h_budget // (4 * max_feat_pad)) // _SUBLANE * _SUBLANE)
    tm = min(block_m, _round_up(batch, _SUBLANE), tm_cap)
    # Keep >= 2 batch tiles when the batch allows it so megacore parts (v7x)
    # shard the "parallel" axis across both TensorCores.
    if batch >= 2 * _SUBLANE and pl.cdiv(batch, tm) < 2:
        tm = max(_SUBLANE, _round_up(pl.cdiv(batch, 2), _SUBLANE))

    grid = (pl.cdiv(batch, tm),)

    in_specs = [pl.BlockSpec((tm, in_dim), lambda i: (i, 0))]
    flat_params = []
    for w_p, b_p in padded_params:
        in_specs.append(_resident_spec(w_p.shape))
        in_specs.append(_resident_spec(b_p.shape))
        flat_params += [w_p, b_p]
    out_specs = pl.BlockSpec((tm, out_pad), lambda i: (i, 0))

    # Advisory cost estimate for XLA's scheduler.
    flops = 2 * batch * sum(w.shape[0] * w.shape[1] for w, _ in padded_params)
    bytes_accessed = (
        x.size * 4
        + sum(w.size * 2 + b.size * 4 for w, b in padded_params)
        + batch * out_pad * 4
    )
    cost = pl.CostEstimate(flops=flops, transcendentals=0,
                           bytes_accessed=bytes_accessed)

    # VMEM budget derived from the actual hardware capacity.
    resident = sum(w.size * w.dtype.itemsize + b.size * b.dtype.itemsize
                   for w, b in padded_params)
    tile_io = 2 * tm * (in_dim + out_pad) * 4       # double-buffered x / out tiles
    live_h = 2 * tm * max_feat_pad * 4              # in-flight f32 intermediates
    want = resident + tile_io + live_h
    vmem_cap = _vmem_capacity_bytes()
    if resident > 0.6 * vmem_cap:
        # TODO(synk): K/N-tiled accumulator fallback for non-resident weights.
        raise NotImplementedError("MLP weights exceed the VMEM-resident budget")
    vmem_limit = int(min(max(2 * want, 32 << 20), int(0.8 * vmem_cap)))

    out_p = pl.pallas_call(
        _fused_mlp_kernel,
        out_shape=jax.ShapeDtypeStruct((batch, out_pad), jnp.float32),
        grid=grid,
        in_specs=in_specs,
        out_specs=out_specs,
        compiler_params=pltpu.CompilerParams(
            # batch tiles are independent -> shard across TCs on megacore parts
            dimension_semantics=("parallel",),
            vmem_limit_bytes=vmem_limit,
        ),
        cost_estimate=cost,
    )(x, *flat_params)

    return out_p[:, :out_dim]


def mlp_reference(params, x):
    h = x
    n = len(params)
    for i, (w, b) in enumerate(params):
        h = h @ w + b
        if i != n - 1:
            h = jnp.maximum(h, 0.0)
    return h


if __name__ == "__main__":
    input_dim, hidden_dim, output_dim, num_layers = 16, 32, 8, 2
    batch = 8

    key = jax.random.PRNGKey(0)
    key, kx = jax.random.split(key)
    x = jax.random.normal(kx, (batch, input_dim), jnp.float32)

    params = init_mlp_params(key, input_dim, hidden_dim, output_dim, num_layers)
    padded_params = pad_mlp_params(params)   # hoisted: done once, not per call

    fwd = jax.jit(functools.partial(mlp_forward, out_dim=output_dim))
    out = jax.block_until_ready(fwd(padded_params, x))

    ref = mlp_reference(params, x)
    assert out.shape == (batch, output_dim)
    # bf16 MXU operands (f32 accumulate) -> loosened tolerance vs the f32 reference.
    assert jnp.allclose(out, ref, atol=2e-2, rtol=2e-2), float(
        jnp.max(jnp.abs(out - ref)))

    print("KERNEL_OK")
</pallas_src>

<mosaic_0001>
module attributes {stable_mosaic.version = 11 : i64} {
  func.func @_fused_mlp_kernel(%arg0: i32, %arg1: memref<8x16xf32, #tpu.memory_space<vmem>>, %arg2: memref<16x128xbf16, #tpu.memory_space<vmem>>, %arg3: memref<1x128xf32, #tpu.memory_space<vmem>>, %arg4: memref<128x128xbf16, #tpu.memory_space<vmem>>, %arg5: memref<1x128xf32, #tpu.memory_space<vmem>>, %arg6: memref<128x128xbf16, #tpu.memory_space<vmem>>, %arg7: memref<1x128xf32, #tpu.memory_space<vmem>>, %arg8: memref<8x128xf32, #tpu.memory_space<vmem>>) attributes {dimension_semantics = [#tpu.dimension_semantics<parallel>], iteration_bounds = array<i64: 1>, scalar_prefetch = 0 : i64, scratch_operands = 0 : i64, tpu.core_type = #tpu.core_type<tc>, window_params = [{transform_indices = @transform_0, window_bounds = array<i64: 8, 16>}, {pipeline_mode = #tpu.pipeline_mode<synchronous>, transform_indices = @transform_1, window_bounds = array<i64: 16, 128>}, {pipeline_mode = #tpu.pipeline_mode<synchronous>, transform_indices = @transform_2, window_bounds = array<i64: 1, 128>}, {pipeline_mode = #tpu.pipeline_mode<synchronous>, transform_indices = @transform_3, window_bounds = array<i64: 128, 128>}, {pipeline_mode = #tpu.pipeline_mode<synchronous>, transform_indices = @transform_4, window_bounds = array<i64: 1, 128>}, {pipeline_mode = #tpu.pipeline_mode<synchronous>, transform_indices = @transform_5, window_bounds = array<i64: 128, 128>}, {pipeline_mode = #tpu.pipeline_mode<synchronous>, transform_indices = @transform_6, window_bounds = array<i64: 1, 128>}, {transform_indices = @transform_7, window_bounds = array<i64: 8, 128>}]} {
    %c0 = arith.constant 0 : index
    %c0_0 = arith.constant 0 : index
    %0 = vector.load %arg1[%c0, %c0_0] : memref<8x16xf32, #tpu.memory_space<vmem>>, vector<8x16xf32>
    %c0_1 = arith.constant 0 : index
    %c0_2 = arith.constant 0 : index
    %1 = vector.load %arg2[%c0_1, %c0_2] : memref<16x128xbf16, #tpu.memory_space<vmem>>, vector<16x128xbf16>
    %c0_3 = arith.constant 0 : index
    %c0_4 = arith.constant 0 : index
    %2 = vector.load %arg3[%c0_3, %c0_4] : memref<1x128xf32, #tpu.memory_space<vmem>>, vector<1x128xf32>
    %3 = arith.truncf %0 : vector<8x16xf32> to vector<8x16xbf16>
    %cst = arith.constant dense<0.000000e+00> : vector<8x128xf32>
    %4 = tpu.matmul %3, %1, %cst {dimension_numbers = #tpu.dot_dimension_numbers<[1], [0], [0], [1], [0, 0, 1, 1], [], []>} : vector<8x16xbf16>, vector<16x128xbf16>, vector<8x128xf32> -> vector<8x128xf32>
    %5 = vector.broadcast %2 : vector<1x128xf32> to vector<8x128xf32>
    %6 = arith.addf %4, %5 : vector<8x128xf32>
    %cst_5 = arith.constant 0.000000e+00 : f32
    %7 = vector.broadcast %cst_5 : f32 to vector<8x128xf32>
    %8 = arith.maximumf %6, %7 : vector<8x128xf32>
    %c0_6 = arith.constant 0 : index
    %c0_7 = arith.constant 0 : index
    %9 = vector.load %arg4[%c0_6, %c0_7] : memref<128x128xbf16, #tpu.memory_space<vmem>>, vector<128x128xbf16>
    %c0_8 = arith.constant 0 : index
    %c0_9 = arith.constant 0 : index
    %10 = vector.load %arg5[%c0_8, %c0_9] : memref<1x128xf32, #tpu.memory_space<vmem>>, vector<1x128xf32>
    %11 = arith.truncf %8 : vector<8x128xf32> to vector<8x128xbf16>
    %cst_10 = arith.constant dense<0.000000e+00> : vector<8x128xf32>
    %12 = tpu.matmul %11, %9, %cst_10 {dimension_numbers = #tpu.dot_dimension_numbers<[1], [0], [0], [1], [0, 0, 1, 1], [], []>} : vector<8x128xbf16>, vector<128x128xbf16>, vector<8x128xf32> -> vector<8x128xf32>
    %13 = vector.broadcast %10 : vector<1x128xf32> to vector<8x128xf32>
    %14 = arith.addf %12, %13 : vector<8x128xf32>
    %cst_11 = arith.constant 0.000000e+00 : f32
    %15 = vector.broadcast %cst_11 : f32 to vector<8x128xf32>
    %16 = arith.maximumf %14, %15 : vector<8x128xf32>
    %c0_12 = arith.constant 0 : index
    %c0_13 = arith.constant 0 : index
    %17 = vector.load %arg6[%c0_12, %c0_13] : memref<128x128xbf16, #tpu.memory_space<vmem>>, vector<128x128xbf16>
    %c0_14 = arith.constant 0 : index
    %c0_15 = arith.constant 0 : index
    %18 = vector.load %arg7[%c0_14, %c0_15] : memref<1x128xf32, #tpu.memory_space<vmem>>, vector<1x128xf32>
    %19 = arith.truncf %16 : vector<8x128xf32> to vector<8x128xbf16>
    %cst_16 = arith.constant dense<0.000000e+00> : vector<8x128xf32>
    %20 = tpu.matmul %19, %17, %cst_16 {dimension_numbers = #tpu.dot_dimension_numbers<[1], [0], [0], [1], [0, 0, 1, 1], [], []>} : vector<8x128xbf16>, vector<128x128xbf16>, vector<8x128xf32> -> vector<8x128xf32>
    %21 = vector.broadcast %18 : vector<1x128xf32> to vector<8x128xf32>
    %22 = arith.addf %20, %21 : vector<8x128xf32>
    %c0_17 = arith.constant 0 : index
    %c0_18 = arith.constant 0 : index
    %23 = vector.load %arg8[%c0_17, %c0_18] : memref<8x128xf32, #tpu.memory_space<vmem>>, vector<8x128xf32>
    tpu.vector_store %arg8[%c0_17, %c0_18], %22 {strides = array<i32>} : memref<8x128xf32, #tpu.memory_space<vmem>>, vector<8x128xf32>,
    return
  }
  func.func @transform_0(%arg0: i32) -> (i32, i32) {
    %c0_i32 = arith.constant 0 : i32
    %c0_i32_0 = arith.constant 0 : i32
    return %arg0, %c0_i32 : i32, i32
  }
  func.func @transform_1(%arg0: i32) -> (i32, i32) {
    %c0_i32 = arith.constant 0 : i32
    %c0_i32_0 = arith.constant 0 : i32
    %c0_i32_1 = arith.constant 0 : i32
    return %c0_i32, %c0_i32_0 : i32, i32
  }
  func.func @transform_2(%arg0: i32) -> (i32, i32) {
    %c0_i32 = arith.constant 0 : i32
    %c0_i32_0 = arith.constant 0 : i32
    %c0_i32_1 = arith.constant 0 : i32
    return %c0_i32, %c0_i32_0 : i32, i32
  }
  func.func @transform_3(%arg0: i32) -> (i32, i32) {
    %c0_i32 = arith.constant 0 : i32
    %c0_i32_0 = arith.constant 0 : i32
    %c0_i32_1 = arith.constant 0 : i32
    return %c0_i32, %c0_i32_0 : i32, i32
  }
  func.func @transform_4(%arg0: i32) -> (i32, i32) {
    %c0_i32 = arith.constant 0 : i32
    %c0_i32_0 = arith.constant 0 : i32
    %c0_i32_1 = arith.constant 0 : i32
    return %c0_i32, %c0_i32_0 : i32, i32
  }
  func.func @transform_5(%arg0: i32) -> (i32, i32) {
    %c0_i32 = arith.constant 0 : i32
    %c0_i32_0 = arith.constant 0 : i32
    %c0_i32_1 = arith.constant 0 : i32
    return %c0_i32, %c0_i32_0 : i32, i32
  }
  func.func @transform_6(%arg0: i32) -> (i32, i32) {
    %c0_i32 = arith.constant 0 : i32
    %c0_i32_0 = arith.constant 0 : i32
    %c0_i32_1 = arith.constant 0 : i32
    return %c0_i32, %c0_i32_0 : i32, i32
  }
  func.func @transform_7(%arg0: i32) -> (i32, i32) {
    %c0_i32 = arith.constant 0 : i32
    %c0_i32_0 = arith.constant 0 : i32
    return %arg0, %c0_i32 : i32, i32
  }
}

</mosaic_0001>

<bundles_post_ra>
// kernel: mlp_forward.1
= control target key start
LH: loop header
LB: loop body
LE: loop exit
PB: predicated region body
PF: predicated region fallthrough
CT: control target
= control target key end

     0   :  { %12 = vsyncpa [#allocation3], 0  ;;  %s723_s0 = inlined_call_operand.vmem [shape: f32[8,16], index: 0, kind: input, shape index: {}]   ;;  %s724_s1 = inlined_call_operand.hbm [shape: bf16[16,128], index: 1, kind: input, shape index: {}]   ;;  %s725_s2 = inlined_call_operand.vmem [shape: f32[1,128], index: 2, kind: input, shape index: {}]   ;;  %s726_s3 = inlined_call_operand.hbm [shape: bf16[128,128], index: 3, kind: input, shape index: {}]   ;;  %s727_s4 = inlined_call_operand.vmem [shape: f32[1,128], index: 4, kind: input, shape index: {}]   ;;  %s728_s5 = inlined_call_operand.hbm [shape: bf16[128,128], index: 5, kind: input, shape index: {}]   ;;  %s729_s6 = inlined_call_operand.vmem [shape: f32[1,128], index: 6, kind: input, shape index: {}]   ;;  %s730_s7 = inlined_call_operand.hbm [shape: f32[8,128], index: 7, kind: output, shape index: {}]  }
   0x1   :  { %13 = vsyncpa [#allocation6], 0 }
   0x2   :  { %14 = vsyncpa [#allocation4], 0  ;;  %s579_s24 = smov [#allocation5]   ;;  %s580_s26 = smov [#allocation2]  }
   0x3   :  { %s36_s25 = sshll.u32 %s579_s24, 4  ;;  %s22_s27 = sshll.u32 %s580_s26, 4  ;;  %s37_s25 = int_to_ptr.vmem [resolvable:$true] %s36_s25  ;;  %s627_s27 = int_to_ptr.vmem [resolvable:$true] %s22_s27 }
   0x4   :  { %s485_s30 = scalar_lea.hbm %s726_s3, 1024 }
   0x5   :  { %p486_p0 = scmp.ne.s32.totalorder %s726_s3, %s485_s30  ;;  %p489_p1 = scmp.lt.u32.totalorder %s485_s30, %s726_s3 }
   0x7   :  { %p491_p2 = pnand %p489_p1, %p486_p0 }
   0x9   :  { %494 = shalt.err (!%p491_p2)
}
   0xa   :  { %s495_s12 = scalar_lea.vmem %s37_s25, 1024  ;;  %p500_p4 = scmp.lt.s32.totalorder %s37_s25, %s37_s25 }
   0xb   :  { %p496_p3 = scmp.ne.s32.totalorder %s37_s25, %s495_s12  ;;  %p501_p5 = scmp.lt.s32.totalorder %s495_s12, %s495_s12 }
   0xd   :  { %p502_p6 = por %p501_p5, %p500_p4 }
   0xf   :  { %p503_p7 = pnand %p502_p6, %p496_p3 }
  0x11   :  { %506 = shalt.err (!%p503_p7)
}
  0x12   :  { %s581_s13 = smov 64   ;;  %s582_s14 = smov 4  }
  0x13   :  { %42 = dma.hbm_to_vmem [thread:$0]  %s726_s3, 1024, %s37_s25, [#allocation6], %s581_s13, %s581_s13, %s582_s14  }
  0x14   :  { %s507_s19 = scalar_lea.hbm %s724_s1, 128 }
  0x15   :  { %p508_p8 = scmp.ne.s32.totalorder %s724_s1, %s507_s19  ;;  %p511_p9 = scmp.lt.u32.totalorder %s507_s19, %s724_s1 }
  0x17   :  { %p513_p10 = pnand %p511_p9, %p508_p8 }
  0x19   :  { %516 = shalt.err (!%p513_p10)
}
  0x1a   :  { %s517_s24 = scalar_lea.vmem %s627_s27, 128  ;;  %p522_p12 = scmp.lt.s32.totalorder %s627_s27, %s627_s27 }
  0x1b   :  { %p518_p11 = scmp.ne.s32.totalorder %s627_s27, %s517_s24  ;;  %p523_p13 = scmp.lt.s32.totalorder %s517_s24, %s517_s24 }
  0x1d   :  { %p524_p0 = por %p523_p13, %p522_p12 }
  0x1f   :  { %p525_p1 = pnand %p524_p0, %p518_p11 }
  0x21   :  { %528 = shalt.err (!%p525_p1)
}
  0x22   :  { %28 = dma.hbm_to_vmem [thread:$0]  %s724_s1, 128, %s627_s27, [#allocation3], %s581_s13, %s581_s13, %s582_s14  }
  0x23   :  { %s583_s26 = smov [#allocation7]   ;;  %s529_s8 = scalar_lea.hbm %s728_s5, 1024 }
  0x24   :  { %s50_s28 = sshll.u32 %s583_s26, 4  ;;  %p530_p2 = scmp.ne.s32.totalorder %s728_s5, %s529_s8  ;;  %s51_s28 = int_to_ptr.vmem [resolvable:$true] %s50_s28 }
  0x25   :  { %p533_p3 = scmp.lt.u32.totalorder %s529_s8, %s728_s5 }
  0x27   :  { %p535_p4 = pnand %p533_p3, %p530_p2 }
  0x29   :  { %538 = shalt.err (!%p535_p4)
}
  0x2a   :  { %s539_s15 = scalar_lea.vmem %s51_s28, 1024  ;;  %p544_p6 = scmp.lt.s32.totalorder %s51_s28, %s51_s28 }
  0x2b   :  { %p540_p5 = scmp.ne.s32.totalorder %s51_s28, %s539_s15  ;;  %p545_p7 = scmp.lt.s32.totalorder %s539_s15, %s539_s15 }
  0x2d   :  { %p546_p8 = por %p545_p7, %p544_p6 }
  0x2f   :  { %p547_p9 = pnand %p546_p8, %p540_p5 }
  0x31   :  { %550 = shalt.err (!%p547_p9)
}
  0x32   :  { %56 = dma.hbm_to_vmem [thread:$0]  %s728_s5, 1024, %s51_s28, [#allocation6], %s581_s13, %s581_s13, %s582_s14  }
  0x33   :  { %573 = dma.done.wait [#allocation3], 128  }
  0x34   :  { %574 = vsyncadd [#allocation3], 4294967168 }
  0x35   :  { %575 = dma.done.wait [#allocation6], 2048  }
  0x36   :  { %576 = vsyncadd [#allocation6], 4294965248  ;;  %v584_v0 = vmov 0.0   ;;  %vm585_vm0 = vmmov 0   ;;  %v468_v1 = vld [vmem:[#allocation2] sm:$0xff]   ;;  %v69_v2 = vld [vmem:[%s723_s0] sm:$0xff] }
  0x37   :  { %414 = vmatprep.subr.bf16.mxu0 %v584_v0  ;;  %416 = vmatprep.mubr.msk.bf16.mxu0 %vm585_vm0, %v584_v0  ;;  %v73_v3 = vpack.c.bf16 %v69_v2, %v69_v2  ;;  %vm86_vm1 = vcmask 130048   ;;  %v469_v4 = vld [vmem:[#allocation5] sm:$0xff]   ;;  %v470_v5 = vld [vmem:[#allocation5 + $0x8] sm:$0xff]   ;;  %v471_v6 = vld [vmem:[#allocation5 + $0x10] sm:$0xff]   ;;  %s586_s19 = smov [#allocation8]  }
  0x38   :  { %420 = vmatprep.subr.bf16.mxu1 %v584_v0  ;;  %436 = vmatprep.mubr.msk.bf16.mxu1 %vm585_vm0, %v584_v0  ;;  %v472_v7 = vld [vmem:[#allocation5 + $0x18] sm:$0xff]   ;;  %v473_v8 = vld [vmem:[#allocation5 + $0x20] sm:$0xff]   ;;  %v474_v9 = vld [vmem:[#allocation5 + $0x28] sm:$0xff]   ;;  %s363_s20 = sshll.u32 %s586_s19, 4  ;;  %s364_s20 = int_to_ptr.vmem [resolvable:$true] %s363_s20 }
  0x39   :  { %415 = vmatpush3.bf16.msra.mxu0 %v468_v1  ;;  %421 = vmatpush3.bf16.msra.mxu1 %v469_v4  ;;  %v475_v10 = vld [vmem:[#allocation5 + $0x30] sm:$0xff]   ;;  %v476_v11 = vld [vmem:[#allocation5 + $0x38] sm:$0xff]   ;;  %v477_v12 = vld [vmem:[#allocation7] sm:$0xff]   ;;  %p556_p11 = scmp.lt.s32.totalorder %s364_s20, %s364_s20 }
  0x3a   :  { %440 = vmatprep.subr.bf16.mxu0 %v584_v0  ;;  %422 = vmatprep.subr.bf16.mxu1 %v584_v0  ;;  %v478_v13 = vld [vmem:[#allocation7 + $0x8] sm:$0xff]   ;;  %v479_v14 = vld [vmem:[#allocation7 + $0x10] sm:$0xff]   ;;  %v480_v15 = vld [vmem:[#allocation7 + $0x18] sm:$0xff]  }
  0x3b   :  { %v481_v16 = vld [vmem:[#allocation7 + $0x20] sm:$0xff]   ;;  %v482_v17 = vld [vmem:[#allocation7 + $0x28] sm:$0xff]   ;;  %v373_v18 = vld [vmem:[%s725_s2] ss:$0 sm:$0xff] }
  0x3c   :  { %417 = vmatmul.mubr.msk.bf16.vlgmr.msra.gmra.mrb[0].mxu0 %vm86_vm1, %v73_v3  ;;  %v483_v26 = vld [vmem:[#allocation7 + $0x30] sm:$0xff]   ;;  %v484_v27 = vld [vmem:[#allocation7 + $0x38] sm:$0xff]  }
  0x3d   :  { %456 = vmatprep.mubr.msk.bf16.mxu0 %vm585_vm0, %v584_v0  ;;  %423 = vmatpush3.bf16.msra.mxu1 %v470_v5  ;;  %v376_v28 = vld [vmem:[%s727_s4] ss:$0 sm:$0xff]  ;;  %s551_s4 = scalar_lea.vmem %s364_s20, 128 }
  0x3e   :  { %424 = vmatprep.subr.bf16.mxu1 %v584_v0  ;;  %441 = vmatpush3.bf16.msra.mxu0 %v477_v12  ;;  %v385_v36 = vld [vmem:[%s729_s6] ss:$0 sm:$0xff]  ;;  %p552_p10 = scmp.ne.s32.totalorder %s364_s20, %s551_s4  ;;  %p557_p12 = scmp.lt.s32.totalorder %s551_s4, %s551_s4 }
  0x3f   :  { %442 = vmatprep.subr.bf16.mxu0 %v584_v0 }
  0x40   :  { %p558_p13 = por %p557_p12, %p556_p11 }
  0x41   :  { %425 = vmatpush3.bf16.msra.mxu1 %v471_v6 }
  0x42   :  { %426 = vmatprep.subr.bf16.mxu1 %v584_v0  ;;  %443 = vmatpush3.bf16.msra.mxu0 %v478_v13  ;;  %p559_p0 = pnand %p558_p13, %p552_p10 }
  0x43   :  { %444 = vmatprep.subr.bf16.mxu0 %v584_v0 }
  0x45   :  { %427 = vmatpush3.bf16.msra.mxu1 %v472_v7 }
  0x46   :  { %428 = vmatprep.subr.bf16.mxu1 %v584_v0  ;;  %445 = vmatpush3.bf16.msra.mxu0 %v479_v14 }
  0x47   :  { %446 = vmatprep.subr.bf16.mxu0 %v584_v0 }
  0x49   :  { %429 = vmatpush3.bf16.msra.mxu1 %v473_v8 }
  0x4a   :  { %430 = vmatprep.subr.bf16.mxu1 %v584_v0  ;;  %447 = vmatpush3.bf16.msra.mxu0 %v480_v15 }
  0x4b   :  { %448 = vmatprep.subr.bf16.mxu0 %v584_v0 }
  0x4d   :  { %431 = vmatpush3.bf16.msra.mxu1 %v474_v9 }
  0x4e   :  { %432 = vmatprep.subr.bf16.mxu1 %v584_v0  ;;  %449 = vmatpush3.bf16.msra.mxu0 %v481_v16 }
  0x4f   :  { %450 = vmatprep.subr.bf16.mxu0 %v584_v0 }
  0x51   :  { %433 = vmatpush3.bf16.msra.mxu1 %v475_v10 }
  0x52   :  { %434 = vmatprep.subr.bf16.mxu1 %v584_v0  ;;  %451 = vmatpush3.bf16.msra.mxu0 %v482_v17 }
  0x53   :  { %452 = vmatprep.subr.bf16.mxu0 %v584_v0 }
  0x55   :  { %435 = vmatpush3.bf16.msra.mxu1 %v476_v11 }
  0x56   :  { %453 = vmatpush3.bf16.msra.mxu0 %v483_v26 }
  0x57   :  { %454 = vmatprep.subr.bf16.mxu0 %v584_v0 }
  0x5a   :  { %455 = vmatpush3.bf16.msra.mxu0 %v484_v27 }
 0x10f   :  { %v124_v19 = vpop.f32.mrb[0].mxu0 }
 0x110   :  { %v125_v20 = vadd.f32 %v373_v18, %v124_v19  ;;  %v418_v21 = vpop.f32.mrb[1].mxu0 }
 0x111   :  { %v127_v22 = vpop.f32.mrb[2].mxu0 }
 0x112   :  { %v130_v23 = vmax.f32 %v125_v20, 0.0  ;;  %v419_v24 = vpop.f32.mrb[3].mxu0 }
 0x114   :  { %v148_v25 = vpack.c.bf16 %v130_v23, %v130_v23 }
 0x116   :  { %437 = vmatmul.mubr.bf16.vlgmr.msra.gmra.mrb[0].mxu1 %v148_v25 }
 0x1e9   :  { %v237_v29 = vpop.f32.mrb[0].mxu1 }
 0x1ea   :  { %v238_v30 = vadd.f32 %v376_v28, %v237_v29  ;;  %v438_v31 = vpop.f32.mrb[1].mxu1 }
 0x1eb   :  { %v240_v32 = vpop.f32.mrb[2].mxu1 }
 0x1ec   :  { %v243_v33 = vmax.f32 %v238_v30, 0.0  ;;  %v439_v34 = vpop.f32.mrb[3].mxu1 }
 0x1ee   :  { %v261_v35 = vpack.c.bf16 %v243_v33, %v243_v33 }
 0x1f0   :  { %457 = vmatmul.mubr.bf16.vlgmr.msra.gmra.mrb[4].mxu0 %v261_v35 }
 0x2c3   :  { %v350_v37 = vpop.f32.mrb[4].mxu0 }
 0x2c4   :  { %v351_v38 = vadd.f32 %v385_v36, %v350_v37  ;;  %v458_v39 = vpop.f32.mrb[5].mxu0 }
 0x2c5   :  { %v353_v40 = vpop.f32.mrb[6].mxu0 }
 0x2c6   :  { %356 = vst [vmem:[#allocation8] sm:$0xff] %v351_v38  ;;  %v459_v41 = vpop.f32.mrb[7].mxu0 }
 0x2c7   :  { %562 = shalt.err (!%p559_p0)
}
 0x2c8   :  { %s563_s6 = scalar_lea.hbm %s730_s7, 128 }
 0x2c9   :  { %p564_p1 = scmp.ne.s32.totalorder %s730_s7, %s563_s6  ;;  %p567_p2 = scmp.lt.u32.totalorder %s563_s6, %s730_s7 }
 0x2cb   :  { %p569_p3 = pnand %p567_p2, %p564_p1 }
 0x2cd   :  { %572 = shalt.err (!%p569_p3)
}
 0x2ce   :  { %366 = dma.vmem_to_hbm [thread:$0]  %s364_s20, 128, %s730_s7, [#allocation4]  }
 0x2cf   :  { %577 = dma.done.wait [#allocation4], 128  }
 0x2d0   :  { %578 = vsyncadd [#allocation4], 4294967168 }
 0x2d1   :  { %370 = vsyncpa [#allocation3], 1 }
 0x2d2   :  { %371 = vsyncpa [#allocation6], 1 }
 0x2d3   :  { %372 = vsyncpa [#allocation4], 1 }

</bundles_post_ra>
